<compile_context>
chip_gen: v6e
topology: v6e:2x2x1
jax: 0.10.0
libtpu: 0.0.40
codegen_flags: <defaults>
</compile_context>

<pallas_src>
import functools
import math

import jax
import jax.numpy as jnp
from jax import lax
from jax.experimental import pallas as pl
from jax.experimental.pallas import tpu as pltpu


# Finite "-inf": exp underflows to 0; fully-masked rows degenerate to a uniform
# row instead of NaN (torch with -np.inf would give NaN) -- documented deviation.
_NEG_LARGE = -1e30


def _round_up(x, m):
    return (x + m - 1) // m * m


def _vmem_capacity_bytes():
    """Per-core VMEM capacity, with a conservative fallback (v7x = 64 MiB)."""
    try:
        info = pltpu.get_tpu_info()
        for name in ("vmem_capacity_bytes", "vmem_size_bytes", "vmem_bytes"):
            cap = getattr(info, name, None)
            if cap:
                return int(cap)
    except Exception:
        pass
    return 64 << 20


def _attention_body(q_ref, k_ref, v_ref, mask_ref, out_ref, attn_ref, inv_temp):
    # Blocks: q (Bt, tq, Dk), k (Bt, Lk, Dk), v (Bt, Lk, Dv),
    #         mask (Bt, tq, Lk) int8 or None, out (Bt, tq, Dv), attn (Bt, tq, Lk).
    # Fold 1/temperature into q in q's *own* dtype so both MXU operands stay
    # native (bf16 x bf16 -> f32 at full MXU rate; f32 inputs stay f32).
    q = q_ref[...] * jnp.asarray(inv_temp, dtype=q_ref.dtype)

    # scores[b, i, j] = sum_d q[b, i, d] * k[b, j, d]
    # Contract directly on the last dims (no explicit k transpose / XLU work).
    scores = lax.dot_general(
        q, k_ref[...],
        dimension_numbers=(((2,), (2,)), ((0,), (0,))),
        preferred_element_type=jnp.float32,
    )

    if mask_ref is not None:
        # Streamed 1-byte mask; compare+select costs one VPU op per element on a
        # slot with slack (kernel is MXU/HBM bound).
        scores = jnp.where(mask_ref[...] != 0, jnp.float32(_NEG_LARGE), scores)

    # Numerically stable softmax over the key axis (f32 throughout). The full Lk
    # is resident, so each row is finalized in a single grid step.
    s_max = jnp.max(scores, axis=-1, keepdims=True)
    p = jnp.exp(scores - s_max)
    denom = jnp.sum(p, axis=-1, keepdims=True)
    attn = p * (jnp.float32(1.0) / denom)  # exact reciprocal: attn is user-visible

    attn_ref[...] = attn.astype(attn_ref.dtype)

    # output = attn @ v ; probabilities cast to v's dtype, f32 accumulation.
    out = lax.dot_general(
        attn.astype(v_ref.dtype), v_ref[...],
        dimension_numbers=(((2,), (1,)), ((0,), (0,))),
        preferred_element_type=jnp.float32,
    )
    out_ref[...] = out.astype(out_ref.dtype)
    # TODO(synk): training-mode dropout (p=0.1) would need pltpu.prng_seed /
    # pltpu.prng_random_bits; eval-mode dropout is the identity.


def _sdpa_kernel_masked(q_ref, k_ref, v_ref, mask_ref, out_ref, attn_ref, *, inv_temp):
    _attention_body(q_ref, k_ref, v_ref, mask_ref, out_ref, attn_ref, inv_temp)


def _sdpa_kernel_nomask(q_ref, k_ref, v_ref, out_ref, attn_ref, *, inv_temp):
    _attention_body(q_ref, k_ref, v_ref, None, out_ref, attn_ref, inv_temp)


def scaled_dot_product_attention(q, k, v, mask=None, *, temperature):
    """q: [B,Lq,Dk], k: [B,Lk,Dk], v: [B,Lk,Dv], mask: optional bool/int [B,Lq,Lk]."""
    B, Lq, Dk = q.shape
    Bk, Lk, Dk2 = k.shape
    assert Dk == Dk2, "q.size(-1) must equal k.size(-1)"
    assert Bk == B and v.shape[0] == B and v.shape[1] == Lk
    Dv = v.shape[-1]
    masked = mask is not None

    io_bytes = jnp.dtype(q.dtype).itemsize

    # ---- generation-aware VMEM budget -----------------------------------------
    # 128 MiB chips (v5e/v6e) -> ~102 MiB, 64 MiB chip (v7x) -> 48 MiB; always
    # leaves headroom for compiler-internal scratch and the pipeline state.
    cap = _vmem_capacity_bytes()
    budget = max(min(cap - (16 << 20), int(cap * 0.8)), 24 << 20)

    def step_bytes(bt, tq):
        # Pallas double-buffers every pipelined block; intermediates are f32.
        b = 2 * bt * tq * Dk * io_bytes          # q block
        b += 2 * bt * Lk * Dk * io_bytes         # k block (full Lk, resident)
        b += 2 * bt * Lk * Dv * io_bytes         # v block (full Lk, resident)
        if masked:
            b += 2 * bt * tq * Lk                # int8 mask block
        b += 2 * bt * tq * Dv * io_bytes         # out block
        b += 2 * bt * tq * Lk * io_bytes         # attn block
        b += 3 * bt * tq * Lk * 4                # f32 score/prob intermediates
        return b

    def fits(bt, tq):
        return step_bytes(bt, tq) + (4 << 20) <= budget

    # ---- q-tile selection: biggest tile that fits the budget ------------------
    lq8 = _round_up(Lq, 8)
    tq = lq8 if lq8 <= 512 else 512
    # Shrink to 32-aligned power-of-two tiles (keeps int8/bf16 block layouts
    # legal) instead of relying on the VMEM cap when Lk is long.
    while tq > 32 and not fits(1, tq):
        nxt = 256
        while nxt >= 32 and nxt >= tq:
            nxt //= 2
        tq = max(32, nxt)
    Lq_pad = _round_up(Lq, tq)

    # Fold several batch elements into one grid step when the q tile is small,
    # amortizing the ~0.35us per-step overhead, as long as the block still fits.
    Bt = 1
    if tq <= 256:
        max_bt = max(1, 512 // tq)
        for d in range(min(B, max_bt), 0, -1):
            if B % d == 0 and fits(d, tq):
                Bt = d
                break

    grid = (B // Bt, Lq_pad // tq)

    q_in = q if Lq_pad == Lq else jnp.pad(q, ((0, 0), (0, Lq_pad - Lq), (0, 0)))

    in_specs = [
        pl.BlockSpec((Bt, tq, Dk), lambda b, i: (b, i, 0)),
        pl.BlockSpec((Bt, Lk, Dk), lambda b, i: (b, 0, 0)),
        pl.BlockSpec((Bt, Lk, Dv), lambda b, i: (b, 0, 0)),
    ]
    args = [q_in, k, v]

    inv_temp = 1.0 / float(temperature)
    if masked:
        # Stream the mask as 1 byte/element; select happens in-kernel (no dense
        # f32 additive bias is built or DMA'd).
        mask_i8 = (mask != 0).astype(jnp.int8)
        if Lq_pad != Lq:
            mask_i8 = jnp.pad(mask_i8, ((0, 0), (0, Lq_pad - Lq), (0, 0)))
        in_specs.append(pl.BlockSpec((Bt, tq, Lk), lambda b, i: (b, i, 0)))
        args.append(mask_i8)
        kernel = functools.partial(_sdpa_kernel_masked, inv_temp=inv_temp)
    else:
        # Specialized no-mask kernel: no dummy mask is built or streamed.
        kernel = functools.partial(_sdpa_kernel_nomask, inv_temp=inv_temp)

    out_specs = [
        pl.BlockSpec((Bt, tq, Dv), lambda b, i: (b, i, 0)),
        pl.BlockSpec((Bt, tq, Lk), lambda b, i: (b, i, 0)),
    ]
    out_shape = (
        jax.ShapeDtypeStruct((B, Lq_pad, Dv), q.dtype),
        jax.ShapeDtypeStruct((B, Lq_pad, Lk), q.dtype),
    )

    # Megacore (v7x): with >=2 batch chunks shard only on batch so both cores
    # never DMA the same full-Lk K/V blocks; otherwise allow q-tile splitting.
    dim_sem = ("parallel", "arbitrary") if grid[0] >= 2 else ("parallel", "parallel")

    out, attn = pl.pallas_call(
        kernel,
        out_shape=out_shape,
        grid_spec=pltpu.PrefetchScalarGridSpec(
            num_scalar_prefetch=0,
            grid=grid,
            in_specs=in_specs,
            out_specs=out_specs,
        ),
        compiler_params=pltpu.CompilerParams(
            dimension_semantics=dim_sem,
            vmem_limit_bytes=int(budget),
        ),
    )(*args)

    if Lq_pad != Lq:
        out = out[:, :Lq]
        attn = attn[:, :Lq]
    return out, attn


if __name__ == "__main__":
    # Small shapes consistent with the module's forward.
    B, Lq, Lk, Dk, Dv = 2, 8, 8, 32, 32
    temperature = math.sqrt(Dk)

    key = jax.random.PRNGKey(0)
    kq, kk, kv, km = jax.random.split(key, 4)
    q = jax.random.normal(kq, (B, Lq, Dk), dtype=jnp.float32)
    k = jax.random.normal(kk, (B, Lk, Dk), dtype=jnp.float32)
    v = jax.random.normal(kv, (B, Lk, Dv), dtype=jnp.float32)
    mask = jax.random.bernoulli(km, p=0.2, shape=(B, Lq, Lk))
    mask = mask.at[:, :, 0].set(False)  # keep every row at least partly unmasked

    # Masked path + specialized no-mask path (f32).
    out, attn = scaled_dot_product_attention(q, k, v, mask, temperature=temperature)
    out_nm, attn_nm = scaled_dot_product_attention(q, k, v, None, temperature=temperature)
    jax.block_until_ready((out, attn, out_nm, attn_nm))

    # Plain-JAX reference (eval-mode dropout = identity; mask=True is masked out).
    def ref(q, k, v, mask):
        s = jnp.einsum("bqd,bkd->bqk", q, k) / temperature
        if mask is not None:
            s = jnp.where(mask, -jnp.inf, s)
        a = jax.nn.softmax(s, axis=2)
        return jnp.einsum("bqk,bkd->bqd", a, v), a

    out_ref, attn_ref = ref(q, k, v, mask)
    out_ref_nm, attn_ref_nm = ref(q, k, v, None)

    assert jnp.allclose(attn, attn_ref, rtol=2e-3, atol=2e-3), "attn mismatch"
    assert jnp.allclose(out, out_ref, rtol=2e-3, atol=2e-3), "output mismatch"
    assert jnp.allclose(attn_nm, attn_ref_nm, rtol=2e-3, atol=2e-3), "attn (no mask) mismatch"
    assert jnp.allclose(out_nm, out_ref_nm, rtol=2e-3, atol=2e-3), "output (no mask) mismatch"

    # bf16 path: native bf16 MXU operands, bf16 attn writeback.
    qb, kb, vb = (x.astype(jnp.bfloat16) for x in (q, k, v))
    out_b, attn_b = scaled_dot_product_attention(qb, kb, vb, mask, temperature=temperature)
    jax.block_until_ready((out_b, attn_b))
    out_bref, attn_bref = ref(qb.astype(jnp.float32), kb.astype(jnp.float32),
                              vb.astype(jnp.float32), mask)
    assert jnp.allclose(attn_b.astype(jnp.float32), attn_bref, rtol=5e-2, atol=5e-2), \
        "attn (bf16) mismatch"
    assert jnp.allclose(out_b.astype(jnp.float32), out_bref, rtol=5e-2, atol=5e-2), \
        "output (bf16) mismatch"

    print("KERNEL_OK")
</pallas_src>

<mosaic_0001>
module attributes {stable_mosaic.version = 11 : i64} {
  func.func @_sdpa_kernel_masked(%arg0: i32, %arg1: i32, %arg2: memref<2x8x32xf32, #tpu.memory_space<vmem>>, %arg3: memref<2x8x32xf32, #tpu.memory_space<vmem>>, %arg4: memref<2x8x32xf32, #tpu.memory_space<vmem>>, %arg5: memref<2x8x8xi8, #tpu.memory_space<vmem>>, %arg6: memref<2x8x32xf32, #tpu.memory_space<vmem>>, %arg7: memref<2x8x8xf32, #tpu.memory_space<vmem>>) attributes {dimension_semantics = [#tpu.dimension_semantics<parallel>, #tpu.dimension_semantics<parallel>], iteration_bounds = array<i64: 1, 1>, scalar_prefetch = 0 : i64, scratch_operands = 0 : i64, tpu.core_type = #tpu.core_type<tc>, window_params = [{transform_indices = @transform_0, window_bounds = array<i64: 2, 8, 32>}, {transform_indices = @transform_1, window_bounds = array<i64: 2, 8, 32>}, {transform_indices = @transform_2, window_bounds = array<i64: 2, 8, 32>}, {transform_indices = @transform_3, window_bounds = array<i64: 2, 8, 8>}, {transform_indices = @transform_4, window_bounds = array<i64: 2, 8, 32>}, {transform_indices = @transform_5, window_bounds = array<i64: 2, 8, 8>}]} {
    %c0 = arith.constant 0 : index
    %c0_0 = arith.constant 0 : index
    %c0_1 = arith.constant 0 : index
    %0 = vector.load %arg2[%c0, %c0_0, %c0_1] : memref<2x8x32xf32, #tpu.memory_space<vmem>>, vector<2x8x32xf32>
    %cst = arith.constant 0.176776692 : f32
    %1 = vector.broadcast %cst : f32 to vector<2x8x32xf32>
    %2 = arith.mulf %0, %1 : vector<2x8x32xf32>
    %c0_2 = arith.constant 0 : index
    %c0_3 = arith.constant 0 : index
    %c0_4 = arith.constant 0 : index
    %3 = vector.load %arg3[%c0_2, %c0_3, %c0_4] : memref<2x8x32xf32, #tpu.memory_space<vmem>>, vector<2x8x32xf32>
    %cst_5 = arith.constant dense<0.000000e+00> : vector<2x8x8xf32>
    %4 = tpu.matmul %2, %3, %cst_5 {dimension_numbers = #tpu.dot_dimension_numbers<[2], [2], [1], [1], [0, 0, 0, 1, 1, 1], [0], [0]>} : vector<2x8x32xf32>, vector<2x8x32xf32>, vector<2x8x8xf32> -> vector<2x8x8xf32>
    %c0_6 = arith.constant 0 : index
    %c0_7 = arith.constant 0 : index
    %c0_8 = arith.constant 0 : index
    %5 = vector.load %arg5[%c0_6, %c0_7, %c0_8] : memref<2x8x8xi8, #tpu.memory_space<vmem>>, vector<2x8x8xi8>
    %c0_i8 = arith.constant 0 : i8
    %6 = vector.broadcast %c0_i8 : i8 to vector<2x8x8xi8>
    %7 = arith.cmpi ne, %5, %6 : vector<2x8x8xi8>
    %cst_9 = arith.constant -1.000000e+30 : f32
    %8 = vector.broadcast %cst_9 : f32 to vector<2x8x8xf32>
    %9 = arith.select %7, %8, %4 : vector<2x8x8xi1>, vector<2x8x8xf32>
    %cst_10 = arith.constant dense<0xFF800000> : vector<2x8xf32>
    %10 = vector.multi_reduction <maximumf>, %9, %cst_10 [2] : vector<2x8x8xf32> to vector<2x8xf32>
    %11 = vector.shape_cast %10 : vector<2x8xf32> to vector<2x8x1xf32>
    %12 = vector.broadcast %11 : vector<2x8x1xf32> to vector<2x8x8xf32>
    %13 = arith.subf %9, %12 : vector<2x8x8xf32>
    %14 = math.exp %13 : vector<2x8x8xf32>
    %cst_11 = arith.constant dense<0.000000e+00> : vector<2x8xf32>
    %15 = vector.multi_reduction <add>, %14, %cst_11 [2] : vector<2x8x8xf32> to vector<2x8xf32>
    %16 = vector.shape_cast %15 : vector<2x8xf32> to vector<2x8x1xf32>
    %cst_12 = arith.constant 1.000000e+00 : f32
    %17 = vector.broadcast %cst_12 : f32 to vector<2x8x1xf32>
    %18 = arith.divf %17, %16 : vector<2x8x1xf32>
    %19 = vector.broadcast %18 : vector<2x8x1xf32> to vector<2x8x8xf32>
    %20 = arith.mulf %14, %19 : vector<2x8x8xf32>
    %c0_13 = arith.constant 0 : index
    %c0_14 = arith.constant 0 : index
    %c0_15 = arith.constant 0 : index
    %21 = vector.load %arg7[%c0_13, %c0_14, %c0_15] : memref<2x8x8xf32, #tpu.memory_space<vmem>>, vector<2x8x8xf32>
    tpu.vector_store %arg7[%c0_13, %c0_14, %c0_15], %20 {strides = array<i32>} : memref<2x8x8xf32, #tpu.memory_space<vmem>>, vector<2x8x8xf32>,
    %c0_16 = arith.constant 0 : index
    %c0_17 = arith.constant 0 : index
    %c0_18 = arith.constant 0 : index
    %22 = vector.load %arg4[%c0_16, %c0_17, %c0_18] : memref<2x8x32xf32, #tpu.memory_space<vmem>>, vector<2x8x32xf32>
    %cst_19 = arith.constant dense<0.000000e+00> : vector<2x8x32xf32>
    %23 = tpu.matmul %20, %22, %cst_19 {dimension_numbers = #tpu.dot_dimension_numbers<[2], [1], [1], [2], [0, 0, 0, 1, 1, 2], [0], [0]>} : vector<2x8x8xf32>, vector<2x8x32xf32>, vector<2x8x32xf32> -> vector<2x8x32xf32>
    %c0_20 = arith.constant 0 : index
    %c0_21 = arith.constant 0 : index
    %c0_22 = arith.constant 0 : index
    %24 = vector.load %arg6[%c0_20, %c0_21, %c0_22] : memref<2x8x32xf32, #tpu.memory_space<vmem>>, vector<2x8x32xf32>
    tpu.vector_store %arg6[%c0_20, %c0_21, %c0_22], %23 {strides = array<i32>} : memref<2x8x32xf32, #tpu.memory_space<vmem>>, vector<2x8x32xf32>,
    return
  }
  func.func @transform_0(%arg0: i32, %arg1: i32) -> (i32, i32, i32) {
    %c0_i32 = arith.constant 0 : i32
    %c0_i32_0 = arith.constant 0 : i32
    return %arg0, %arg1, %c0_i32 : i32, i32, i32
  }
  func.func @transform_1(%arg0: i32, %arg1: i32) -> (i32, i32, i32) {
    %c0_i32 = arith.constant 0 : i32
    %c0_i32_0 = arith.constant 0 : i32
    %c0_i32_1 = arith.constant 0 : i32
    return %arg0, %c0_i32, %c0_i32_0 : i32, i32, i32
  }
  func.func @transform_2(%arg0: i32, %arg1: i32) -> (i32, i32, i32) {
    %c0_i32 = arith.constant 0 : i32
    %c0_i32_0 = arith.constant 0 : i32
    %c0_i32_1 = arith.constant 0 : i32
    return %arg0, %c0_i32, %c0_i32_0 : i32, i32, i32
  }
  func.func @transform_3(%arg0: i32, %arg1: i32) -> (i32, i32, i32) {
    %c0_i32 = arith.constant 0 : i32
    %c0_i32_0 = arith.constant 0 : i32
    return %arg0, %arg1, %c0_i32 : i32, i32, i32
  }
  func.func @transform_4(%arg0: i32, %arg1: i32) -> (i32, i32, i32) {
    %c0_i32 = arith.constant 0 : i32
    %c0_i32_0 = arith.constant 0 : i32
    return %arg0, %arg1, %c0_i32 : i32, i32, i32
  }
  func.func @transform_5(%arg0: i32, %arg1: i32) -> (i32, i32, i32) {
    %c0_i32 = arith.constant 0 : i32
    %c0_i32_0 = arith.constant 0 : i32
    return %arg0, %arg1, %c0_i32 : i32, i32, i32
  }
}

</mosaic_0001>

<bundles_post_ra>
// kernel: tpu_custom_call.1
= control target key start
LH: loop header
LB: loop body
LE: loop exit
PB: predicated region body
PF: predicated region fallthrough
CT: control target
= control target key end

     0   :  { %11 = vsyncpa [#allocation3], 0  ;;  %s700_s0 = inlined_call_operand.hbm [shape: f32[2,8,32], index: 0, kind: input, shape index: {}]   ;;  %s701_s1 = inlined_call_operand.hbm [shape: f32[2,8,32], index: 1, kind: input, shape index: {}]   ;;  %s702_s2 = inlined_call_operand.hbm [shape: f32[2,8,32], index: 2, kind: input, shape index: {}]   ;;  %s703_s3 = inlined_call_operand.vmem [shape: s8[2,8,8], index: 3, kind: input, shape index: {}]   ;;  %s704_s4 = inlined_call_operand.hbm [shape: f32[2,8,32], index: 4, kind: output, shape index: {0}]   ;;  %s705_s5 = inlined_call_operand.hbm [shape: f32[2,8,8], index: 5, kind: output, shape index: {1}]  }
   0x1   :  { %12 = vsyncpa [#allocation6], 0 }
   0x2   :  { %13 = vsyncpa [#allocation4], 0 }
   0x3   :  { %14 = vsyncpa [#allocation10], 0  ;;  %s606_s18 = smov [#allocation5]   ;;  %s607_s20 = smov [#allocation2]  }
   0x4   :  { %s32_s19 = sshll.u32 %s606_s18, 4  ;;  %s20_s21 = sshll.u32 %s607_s20, 4  ;;  %s33_s19 = int_to_ptr.vmem [resolvable:$true] %s32_s19  ;;  %s21_s21 = int_to_ptr.vmem [resolvable:$true] %s20_s21 }
   0x5   :  { %s506_s22 = scalar_lea.vmem %s33_s19, 256  ;;  %p511_p1 = scmp.lt.s32.totalorder %s33_s19, %s33_s19 }
   0x6   :  { %p507_p0 = scmp.ne.s32.totalorder %s33_s19, %s506_s22  ;;  %p512_p2 = scmp.lt.s32.totalorder %s506_s22, %s506_s22 }
   0x8   :  { %p513_p3 = por %p512_p2, %p511_p1 }
   0xa   :  { %p514_p4 = pnand %p513_p3, %p507_p0 }
   0xc   :  { %517 = shalt.err (!%p514_p4)
}
   0xd   :  { %s608_s23 = smov 128   ;;  %s609_s24 = smov 8  }
   0xe   :  { %38 = dma.hbm_to_vmem [thread:$0]  %s701_s1, 256, %s33_s19, [#allocation6], %s608_s23, %s608_s23, %s609_s24  }
   0xf   :  { %s526_s27 = scalar_lea.vmem %s21_s21, 256  ;;  %p531_p6 = scmp.lt.s32.totalorder %s21_s21, %s21_s21 }
  0x10   :  { %p527_p5 = scmp.ne.s32.totalorder %s21_s21, %s526_s27  ;;  %p532_p7 = scmp.lt.s32.totalorder %s526_s27, %s526_s27 }
  0x12   :  { %p533_p8 = por %p532_p7, %p531_p6 }
  0x14   :  { %p534_p9 = pnand %p533_p8, %p527_p5 }
  0x16   :  { %537 = shalt.err (!%p534_p9)
}
  0x17   :  { %26 = dma.hbm_to_vmem [thread:$0]  %s700_s0, 256, %s21_s21, [#allocation3], %s608_s23, %s608_s23, %s609_s24  }
  0x18   :  { %s610_s30 = smov [#allocation7]  }
  0x19   :  { %s44_s6 = sshll.u32 %s610_s30, 4  ;;  %s45_s6 = int_to_ptr.vmem [resolvable:$true] %s44_s6 }
  0x1a   :  { %s546_s7 = scalar_lea.vmem %s45_s6, 256  ;;  %p551_p11 = scmp.lt.s32.totalorder %s45_s6, %s45_s6 }
  0x1b   :  { %p547_p10 = scmp.ne.s32.totalorder %s45_s6, %s546_s7  ;;  %p552_p12 = scmp.lt.s32.totalorder %s546_s7, %s546_s7 }
  0x1d   :  { %p553_p13 = por %p552_p12, %p551_p11 }
  0x1f   :  { %p554_p0 = pnand %p553_p13, %p547_p10 }
  0x21   :  { %557 = shalt.err (!%p554_p0)
}
  0x22   :  { %50 = dma.hbm_to_vmem [thread:$0]  %s702_s2, 256, %s45_s6, [#allocation6], %s608_s23, %s608_s23, %s609_s24  }
  0x23   :  { %598 = dma.done.wait [#allocation3], 256  }
  0x24   :  { %599 = vsyncadd [#allocation3], 4294967040 }
  0x25   :  { %600 = dma.done.wait [#allocation6], 512  }
  0x26   :  { %601 = vsyncadd [#allocation6], 4294966784  ;;  %v611_v0 = vmov 0.0   ;;  %vm612_vm0 = vmmov 0   ;;  %vm70_vm1 = vcmask 261120   ;;  %v68_v1 = vld [vmem:[#allocation5] sm:$0xff] }
  0x27   :  { %460 = vmatprep.subr.mxu0 %v611_v0  ;;  %465 = vmatprep.subr.mxu1 %v611_v0  ;;  %v69_v2 = vld [vmem:[#allocation5 + $0x8] sm:$0xff]  ;;  %v64_v3 = vld [vmem:[#allocation2] sm:$0xff]  ;;  %v65_v5 = vld [vmem:[#allocation2 + $0x8] sm:$0xff]  ;;  %v613_v9 = vmov 0   ;;  %vm235_vm6 = vcmask 64512  }
  0x28   :  { %462 = vmatprep.mubr.msk.f32.mxu0 %vm612_vm0, %v611_v0  ;;  %467 = vmatprep.mubr.msk.f32.mxu1 %vm612_vm0, %v611_v0  ;;  %v66_v4 = vmul.f32 0.17677669, %v64_v3  ;;  %v67_v6 = vmul.f32 0.17677669, %v65_v5  ;;  %v223_v7 = vld [vmem:[%s703_s3] sm:$0x3] }
  0x29   :  { %461 = vmatpush3.xpose.msk.msra.mxu0 %vm70_vm1, %v68_v1  ;;  %466 = vmatpush3.xpose.msk.msra.mxu1 %vm70_vm1, %v69_v2  ;;  %v224_v8 = vld [vmem:[%s703_s3 + $0x2] sm:$0x3]  ;;  %vm225_vm2 = vnez %v223_v7  ;;  %v263_v33 = vld [vmem:[#allocation7 + $0x8] sm:$0xff]  ;;  %s614_s3 = smov [#allocation9]  }
  0x2a   :  { %470 = vmatprep.subr.mxu0 %v611_v0  ;;  %475 = vmatprep.subr.mxu1 %v611_v0  ;;  %vm226_vm3 = vnez %v224_v8  ;;  %v227_v10 = vsel %vm225_vm2, 16843009, %v613_v9  ;;  %v262_v32 = vld [vmem:[#allocation7] sm:$0xff]  ;;  %s429_s11 = sshll.u32 %s614_s3, 4  ;;  %s430_s11 = int_to_ptr.vmem [resolvable:$true] %s429_s11 }
  0x2b   :  { %v228_v11 = vsel %vm226_vm3, 16843009, %v613_v9  ;;  %v229_v12 = vunpack.c.0.s8 %v227_v10  ;;  %s558_s12 = scalar_lea.vmem %s430_s11, 256  ;;  %p563_p2 = scmp.lt.s32.totalorder %s430_s11, %s430_s11 }
  0x2c   :  { %463 = vmatmul.mubr.msk.f32.vlgmr.msra.gmra.mxu0 %vm70_vm1, %v66_v4  ;;  %468 = vmatmul.mubr.msk.f32.vlgmr.msra.gmra.mxu1 %vm70_vm1, %v67_v6  ;;  %v230_v13 = vunpack.c.0.s8 %v228_v11  ;;  %p559_p1 = scmp.ne.s32.totalorder %s430_s11, %s558_s12  ;;  %p564_p3 = scmp.lt.s32.totalorder %s558_s12, %s558_s12 }
  0x2d   :  { %472 = vmatprep.mubr.msk.f32.mxu0 %vm612_vm0, %v611_v0  ;;  %477 = vmatprep.mubr.msk.f32.mxu1 %vm612_vm0, %v611_v0  ;;  %vm231_vm4 = vcmp.ne.s32.totalorder %v229_v12, 0 }
  0x2e   :  { %vm232_vm5 = vcmp.ne.s32.totalorder %v230_v13, 0  ;;  %471 = vmatpush3.msra.mxu0 %v262_v32  ;;  %476 = vmatpush3.msra.mxu1 %v263_v33  ;;  %p565_p4 = por %p564_p3, %p563_p2 }
  0x30   :  { %p566_p5 = pnand %p565_p4, %p559_p1 }
  0xec   :  { %v143_v14 = vpop.f32.mrf.mxu0  ;;  %v219_v15 = vpop.f32.mrf.mxu1 }
  0xed   :  { %v233_v16 = vsel %vm231_vm4, -1e+30, %v143_v14  ;;  %v234_v17 = vsel %vm232_vm5, -1e+30, %v219_v15 }
  0xee   :  { %v464_v18 = vpop.f32.mrf.mxu0  ;;  %v236_v19 = vsel %vm235_vm6, %v233_v16, -inf  ;;  %v469_v20 = vpop.f32.mrf.mxu1  ;;  %v239_v21 = vsel %vm235_vm6, %v234_v17, -inf }
  0xef   :  { %237 = vmax.xlane.f32.xlu0 %v236_v19 }
  0xf3   :  { %240 = vmax.xlane.f32.xlu0 %v239_v21 }
 0x178   :  { %v238_v22 = vpop.xlane.xlu0 %237 }
 0x179   :  { %v242_v23 = vsub.f32 %v233_v16, %v238_v22 }
 0x17b   :  { %v244_v24 = vmul.f32 1.442695, %v242_v23 }
 0x17c   :  { %v241_v25 = vpop.xlane.xlu0 %240 }
 0x17d   :  { %490 = vpow2.f32 %v244_v24  ;;  %v243_v26 = vsub.f32 %v234_v17, %v241_v25 }
 0x17f   :  { %v246_v27 = vmul.f32 1.442695, %v243_v26 }
 0x181   :  { %492 = vpow2.f32 %v246_v27 }
 0x18a   :  { %v491_v28 = vpop.eup %490 }
 0x18b   :  { %v248_v29 = vsel %vm235_vm6, %v491_v28, 0.0 }
 0x18c   :  { %249 = vadd.xlane.f32.xlu1 %v248_v29 }
 0x18e   :  { %v493_v30 = vpop.eup %492 }
 0x18f   :  { %v251_v31 = vsel %vm235_vm6, %v493_v30, 0.0 }
 0x190   :  { %252 = vadd.xlane.f32.xlu1 %v251_v31 }
 0x215   :  { %v250_v34 = vpop.xlane.xlu1 %249 }
 0x216   :  { %494 = vrcp.f32 %v250_v34 }
 0x219   :  { %v253_v35 = vpop.xlane.xlu1 %252 }
 0x21a   :  { %496 = vrcp.f32 %v253_v35 }
 0x223   :  { %v495_v36 = vpop.eup %494 }
 0x224   :  { %v258_v37 = vmul.f32 %v495_v36, %v491_v28 }
 0x226   :  { %473 = vmatmul.mubr.msk.f32.vlgmr.msra.gmra.mxu0 %vm235_vm6, %v258_v37  ;;  %260 = vst.msk [vmem:[#allocation9] sm:$0xff] %vm235_vm6, %v258_v37 }
 0x227   :  { %v497_v38 = vpop.eup %496 }
 0x228   :  { %v259_v39 = vmul.f32 %v497_v38, %v493_v30 }
 0x22a   :  { %478 = vmatmul.mubr.msk.f32.vlgmr.msra.gmra.mxu1 %vm235_vm6, %v259_v39  ;;  %261 = vst.msk [vmem:[#allocation9 + $0x8] sm:$0xff] %vm235_vm6, %v259_v39 }
 0x22b   :  { %569 = shalt.err (!%p566_p5)
}
 0x22c   :  { %435 = dma.vmem_to_hbm [thread:$0]  %s430_s11, 256, %s705_s5, [#allocation10], %s608_s23, %s608_s23, %s609_s24  }
 0x22d   :  { %s615_s15 = smov [#allocation8]  }
 0x22e   :  { %s417_s16 = sshll.u32 %s615_s15, 4  ;;  %s418_s16 = int_to_ptr.vmem [resolvable:$true] %s417_s16 }
 0x22f   :  { %s578_s17 = scalar_lea.vmem %s418_s16, 256  ;;  %p583_p7 = scmp.lt.s32.totalorder %s418_s16, %s418_s16 }
 0x230   :  { %p579_p6 = scmp.ne.s32.totalorder %s418_s16, %s578_s17  ;;  %p584_p8 = scmp.lt.s32.totalorder %s578_s17, %s578_s17 }
 0x232   :  { %p585_p9 = por %p584_p8, %p583_p7 }
 0x234   :  { %p586_p10 = pnand %p585_p9, %p579_p6 }
 0x2e6   :  { %v333_v40 = vpop.f32.mrf.mxu0 }
 0x2e7   :  { %410 = vst.msk [vmem:[#allocation8] sm:$0xff] %vm70_vm1, %v333_v40 }
 0x2e8   :  { %v474_v41 = vpop.f32.mrf.mxu0 }
 0x2ea   :  { %v406_v42 = vpop.f32.mrf.mxu1 }
 0x2eb   :  { %411 = vst.msk [vmem:[#allocation8 + $0x8] sm:$0xff] %vm70_vm1, %v406_v42 }
 0x2ec   :  { %v479_v43 = vpop.f32.mrf.mxu1 }
 0x2ed   :  { %589 = shalt.err (!%p586_p10)
}
 0x2ee   :  { %423 = dma.vmem_to_hbm [thread:$0]  %s418_s16, 256, %s704_s4, [#allocation4], %s608_s23, %s608_s23, %s609_s24  }
 0x2ef   :  { %602 = dma.done.wait [#allocation4], 256  }
 0x2f0   :  { %603 = vsyncadd [#allocation4], 4294967040 }
 0x2f1   :  { %604 = dma.done.wait [#allocation10], 256  }
 0x2f2   :  { %605 = vsyncadd [#allocation10], 4294967040 }
 0x2f3   :  { %442 = vsyncpa [#allocation3], 1 }
 0x2f4   :  { %443 = vsyncpa [#allocation6], 1 }
 0x2f5   :  { %444 = vsyncpa [#allocation4], 1 }
 0x2f6   :  { %445 = vsyncpa [#allocation10], 1 }

</bundles_post_ra>
